<compile_context>
chip_gen: v5e
topology: v5e:2x2
jax: 0.10.0
libtpu: 0.0.40
codegen_flags: <defaults>
</compile_context>

<pallas_src>
import functools

import jax
import jax.numpy as jnp
import numpy as np
from jax.experimental import pallas as pl
from jax.experimental.pallas import tpu as pltpu


def _round_up(x: int, m: int) -> int:
    return ((x + m - 1) // m) * m


def _bce_mse_kernel(pred_ref, targ_ref, catw_ref, ctnw_ref, out_ref,
                    *, tile_b: int, tiles_per_split: int, batch: int):
    s = pl.program_id(0)   # parallel split (megacore on v7x)
    i = pl.program_id(1)   # reduction step over batch tiles

    # Zero this split's resident accumulator at the start of its inner loop.
    @pl.when(i == 0)
    def _():
        out_ref[...] = jnp.zeros_like(out_ref)

    x = pred_ref[...].astype(jnp.float32)          # (tile_b, Dp) logits / preds
    y = targ_ref[...].astype(jnp.float32)          # (tile_b, Dp) targets
    cat_w = catw_ref[...]                          # (1, Dp): 1/(B*n_cat) on cat cols
    ctn_w = ctnw_ref[...]                          # (1, Dp): 1/(B*n_ctn) on ctn cols

    # Numerically stable BCEWithLogits (matches torch.nn.BCEWithLogitsLoss):
    #   max(x, 0) - x*y + log(1 + exp(-|x|))
    bce = jnp.maximum(x, 0.0) - x * y + jnp.log1p(jnp.exp(-jnp.abs(x)))
    sq = (x - y) * (x - y)

    # Per-loss mean scales are already folded into the weights -> one reduction.
    elem = bce * cat_w + sq * ctn_w                # (tile_b, Dp)

    # Mask out batch-padding rows (padded rows would otherwise add log(2) terms).
    row0 = (s * tiles_per_split + i) * tile_b
    rows = row0 + jax.lax.broadcasted_iota(jnp.int32, elem.shape, 0)
    elem = jnp.where(rows < batch, elem, 0.0)

    out_ref[...] = out_ref[...] + jnp.sum(elem)


def bce_mse_loss(pred, target, cat_columns, ctn_columns, *,
                 num_splits: int = 2,
                 input_vmem_budget_bytes: int = 32 * 1024 * 1024,
                 vmem_limit_bytes: int = 48 * 1024 * 1024):
    """pred, target: (B, D). cat_columns / ctn_columns: 1-D int index arrays
    (assumed unique, as in the typical usage of the torch module)."""
    B, D = pred.shape
    cat_columns = np.asarray(cat_columns)
    ctn_columns = np.asarray(ctn_columns)

    # Lane-dense feature dim: pad D up to a multiple of 128.
    Dp = max(_round_up(D, 128), 128)

    # Fold each loss' mean (1/(B*n_cols)) into per-column weights. Guard empty
    # column sets (torch would produce nan); they simply contribute 0 here.
    inv_cat = 1.0 / float(B * cat_columns.size) if cat_columns.size else 0.0
    inv_ctn = 1.0 / float(B * ctn_columns.size) if ctn_columns.size else 0.0
    cat_w = np.zeros((1, Dp), np.float32)
    ctn_w = np.zeros((1, Dp), np.float32)
    if cat_columns.size:
        cat_w[0, cat_columns] = inv_cat
    if ctn_columns.size:
        ctn_w[0, ctn_columns] = inv_ctn

    # Tile sizing: 2 inputs x 2 pipeline buffers x (tile_b x Dp) must fit the
    # VMEM budget (chosen so it also fits v7x's smaller 64 MiB VMEM).
    itemsize = jnp.dtype(pred.dtype).itemsize
    max_rows = max(8, (input_vmem_budget_bytes // (4 * Dp * itemsize)) // 8 * 8)
    tile_b = min(max_rows, _round_up(B, 8))

    # Pad batch so it splits evenly into num_splits x tiles_per_split tiles.
    Bp = _round_up(B, num_splits * tile_b)
    tiles_per_split = Bp // (num_splits * tile_b)

    pred_p = jnp.pad(pred, ((0, Bp - B), (0, Dp - D)))
    targ_p = jnp.pad(target, ((0, Bp - B), (0, Dp - D)))

    kernel = functools.partial(_bce_mse_kernel, tile_b=tile_b,
                               tiles_per_split=tiles_per_split, batch=B)

    row_map = lambda s, i: (s * tiles_per_split + i, 0)

    out = pl.pallas_call(
        kernel,
        out_shape=jax.ShapeDtypeStruct((num_splits, 1, 1), jnp.float32),
        grid_spec=pltpu.PrefetchScalarGridSpec(
            num_scalar_prefetch=0,
            grid=(num_splits, tiles_per_split),
            in_specs=[
                pl.BlockSpec((tile_b, Dp), row_map),            # pred tile
                pl.BlockSpec((tile_b, Dp), row_map),            # target tile
                pl.BlockSpec((1, Dp), lambda s, i: (0, 0)),     # cat weights
                pl.BlockSpec((1, Dp), lambda s, i: (0, 0)),     # ctn weights
            ],
            out_specs=pl.BlockSpec((1, 1, 1), lambda s, i: (s, 0, 0)),
        ),
        compiler_params=pltpu.CompilerParams(
            dimension_semantics=("parallel", "arbitrary"),
            vmem_limit_bytes=vmem_limit_bytes),
    )(pred_p, targ_p, jnp.asarray(cat_w), jnp.asarray(ctn_w))

    # Add the per-split (per-core) partial sums.
    return jnp.sum(out)


def _reference(pred, target, cat_columns, ctn_columns):
    x_c = pred[:, cat_columns].astype(jnp.float32)
    y_c = target[:, cat_columns].astype(jnp.float32)
    bce = jnp.mean(jnp.maximum(x_c, 0.0) - x_c * y_c
                   + jnp.log1p(jnp.exp(-jnp.abs(x_c))))
    x_n = pred[:, ctn_columns].astype(jnp.float32)
    y_n = target[:, ctn_columns].astype(jnp.float32)
    mse = jnp.mean((x_n - y_n) ** 2)
    return bce + mse


if __name__ == "__main__":
    # Small shapes consistent with the module's forward: (batch, features).
    B, D = 8, 16
    cat_columns = np.arange(0, 8, dtype=np.int64)    # "categorical" cols -> BCE
    ctn_columns = np.arange(8, 16, dtype=np.int64)   # "continuous"  cols -> MSE

    key = jax.random.PRNGKey(0)
    k_pred, k_cat_t, k_ctn_t = jax.random.split(key, 3)

    pred = jax.random.normal(k_pred, (B, D), dtype=jnp.float32)

    # Targets: 0/1 labels on categorical columns, real values on continuous.
    cat_targets = jax.random.bernoulli(k_cat_t, 0.5, (B, len(cat_columns)))
    ctn_targets = jax.random.normal(k_ctn_t, (B, len(ctn_columns)), jnp.float32)
    target = jnp.zeros((B, D), jnp.float32)
    target = target.at[:, cat_columns].set(cat_targets.astype(jnp.float32))
    target = target.at[:, ctn_columns].set(ctn_targets)

    loss = bce_mse_loss(pred, target, cat_columns, ctn_columns)
    loss = jax.block_until_ready(loss)

    ref = jax.block_until_ready(_reference(pred, target, cat_columns, ctn_columns))
    assert abs(float(loss) - float(ref)) <= 1e-5 + 1e-5 * abs(float(ref)), (
        float(loss), float(ref))

    print("KERNEL_OK")
</pallas_src>

<mosaic_0001>
module attributes {stable_mosaic.version = 11 : i64} {
  func.func @_bce_mse_kernel(%arg0: i32, %arg1: i32, %arg2: memref<8x128xf32, #tpu.memory_space<vmem>>, %arg3: memref<8x128xf32, #tpu.memory_space<vmem>>, %arg4: memref<1x128xf32, #tpu.memory_space<vmem>>, %arg5: memref<1x128xf32, #tpu.memory_space<vmem>>, %arg6: memref<1x1x1xf32, #tpu.memory_space<vmem>>) attributes {dimension_semantics = [#tpu.dimension_semantics<parallel>, #tpu.dimension_semantics<arbitrary>], iteration_bounds = array<i64: 2, 1>, scalar_prefetch = 0 : i64, scratch_operands = 0 : i64, tpu.core_type = #tpu.core_type<tc>, window_params = [{transform_indices = @transform_0, window_bounds = array<i64: 8, 128>}, {transform_indices = @transform_1, window_bounds = array<i64: 8, 128>}, {pipeline_mode = #tpu.pipeline_mode<synchronous>, transform_indices = @transform_2, window_bounds = array<i64: 1, 128>}, {pipeline_mode = #tpu.pipeline_mode<synchronous>, transform_indices = @transform_3, window_bounds = array<i64: 1, 128>}, {transform_indices = @transform_4, window_bounds = array<i64: 1, 1, 1>}]} {
    %c0_i32 = arith.constant 0 : i32
    %0 = arith.cmpi eq, %arg1, %c0_i32 : i32
    %1 = arith.extui %0 : i1 to i32
    %c0_i32_0 = arith.constant 0 : i32
    %2 = arith.cmpi ne, %1, %c0_i32_0 : i32
    scf.if %2 {
      %cst_18 = arith.constant 0.000000e+00 : f32
      %43 = vector.broadcast %cst_18 : f32 to vector<1x1x1xf32>
      %c0_19 = arith.constant 0 : index
      %c0_20 = arith.constant 0 : index
      %c0_21 = arith.constant 0 : index
      %44 = vector.load %arg6[%c0_19, %c0_20, %c0_21] : memref<1x1x1xf32, #tpu.memory_space<vmem>>, vector<1x1x1xf32>
      tpu.vector_store %arg6[%c0_19, %c0_20, %c0_21], %43 {strides = array<i32>} : memref<1x1x1xf32, #tpu.memory_space<vmem>>, vector<1x1x1xf32>,
    } else {
    }
    %c0 = arith.constant 0 : index
    %c0_1 = arith.constant 0 : index
    %3 = vector.load %arg2[%c0, %c0_1] : memref<8x128xf32, #tpu.memory_space<vmem>>, vector<8x128xf32>
    %c0_2 = arith.constant 0 : index
    %c0_3 = arith.constant 0 : index
    %4 = vector.load %arg3[%c0_2, %c0_3] : memref<8x128xf32, #tpu.memory_space<vmem>>, vector<8x128xf32>
    %c0_4 = arith.constant 0 : index
    %c0_5 = arith.constant 0 : index
    %5 = vector.load %arg4[%c0_4, %c0_5] : memref<1x128xf32, #tpu.memory_space<vmem>>, vector<1x128xf32>
    %c0_6 = arith.constant 0 : index
    %c0_7 = arith.constant 0 : index
    %6 = vector.load %arg5[%c0_6, %c0_7] : memref<1x128xf32, #tpu.memory_space<vmem>>, vector<1x128xf32>
    %cst = arith.constant 0.000000e+00 : f32
    %7 = vector.broadcast %cst : f32 to vector<8x128xf32>
    %8 = arith.maximumf %3, %7 : vector<8x128xf32>
    %9 = arith.mulf %3, %4 : vector<8x128xf32>
    %10 = arith.subf %8, %9 : vector<8x128xf32>
    %11 = math.absf %3 : vector<8x128xf32>
    %cst_8 = arith.constant 0.000000e+00 : f32
    %12 = vector.broadcast %cst_8 : f32 to vector<8x128xf32>
    %13 = arith.subf %12, %11 : vector<8x128xf32>
    %14 = math.exp %13 : vector<8x128xf32>
    %15 = math.log1p %14 : vector<8x128xf32>
    %16 = arith.addf %10, %15 : vector<8x128xf32>
    %17 = arith.subf %3, %4 : vector<8x128xf32>
    %18 = arith.subf %3, %4 : vector<8x128xf32>
    %19 = arith.mulf %17, %18 : vector<8x128xf32>
    %20 = vector.broadcast %5 : vector<1x128xf32> to vector<8x128xf32>
    %21 = arith.mulf %16, %20 : vector<8x128xf32>
    %22 = vector.broadcast %6 : vector<1x128xf32> to vector<8x128xf32>
    %23 = arith.mulf %19, %22 : vector<8x128xf32>
    %24 = arith.addf %21, %23 : vector<8x128xf32>
    %c1_i32 = arith.constant 1 : i32
    %25 = arith.muli %arg0, %c1_i32 : i32
    %26 = arith.addi %25, %arg1 : i32
    %c8_i32 = arith.constant 8 : i32
    %27 = arith.muli %26, %c8_i32 : i32
    %28 = tpu.iota {dimensions = array<i32: 0>} : vector<8x128xi32>
    %29 = vector.broadcast %27 : i32 to vector<8x128xi32>
    %30 = arith.addi %29, %28 : vector<8x128xi32>
    %c8_i32_9 = arith.constant 8 : i32
    %31 = vector.broadcast %c8_i32_9 : i32 to vector<8x128xi32>
    %32 = arith.cmpi slt, %30, %31 : vector<8x128xi32>
    %cst_10 = arith.constant 0.000000e+00 : f32
    %33 = vector.broadcast %cst_10 : f32 to vector<8x128xf32>
    %34 = arith.select %32, %24, %33 : vector<8x128xi1>, vector<8x128xf32>
    %c0_11 = arith.constant 0 : index
    %c0_12 = arith.constant 0 : index
    %c0_13 = arith.constant 0 : index
    %35 = vector.load %arg6[%c0_11, %c0_12, %c0_13] : memref<1x1x1xf32, #tpu.memory_space<vmem>>, vector<1x1x1xf32>
    %36 = vector.shape_cast %34 : vector<8x128xf32> to vector<1x8x128xf32>
    %cst_14 = arith.constant dense<0.000000e+00> : vector<1xf32>
    %37 = vector.multi_reduction <add>, %36, %cst_14 [1, 2] : vector<1x8x128xf32> to vector<1xf32>
    %38 = vector.shape_cast %37 : vector<1xf32> to vector<1x1x1xf32>
    %39 = vector.extract %38[0, 0, 0] : f32 from vector<1x1x1xf32>
    %40 = vector.broadcast %39 : f32 to vector<1x1x1xf32>
    %41 = arith.addf %35, %40 : vector<1x1x1xf32>
    %c0_15 = arith.constant 0 : index
    %c0_16 = arith.constant 0 : index
    %c0_17 = arith.constant 0 : index
    %42 = vector.load %arg6[%c0_15, %c0_16, %c0_17] : memref<1x1x1xf32, #tpu.memory_space<vmem>>, vector<1x1x1xf32>
    tpu.vector_store %arg6[%c0_15, %c0_16, %c0_17], %41 {strides = array<i32>} : memref<1x1x1xf32, #tpu.memory_space<vmem>>, vector<1x1x1xf32>,
    return
  }
  func.func @transform_0(%arg0: i32, %arg1: i32) -> (i32, i32) {
    %c1_i32 = arith.constant 1 : i32
    %0 = arith.muli %arg0, %c1_i32 : i32
    %1 = arith.addi %0, %arg1 : i32
    %c0_i32 = arith.constant 0 : i32
    %c0_i32_0 = arith.constant 0 : i32
    return %1, %c0_i32 : i32, i32
  }
  func.func @transform_1(%arg0: i32, %arg1: i32) -> (i32, i32) {
    %c1_i32 = arith.constant 1 : i32
    %0 = arith.muli %arg0, %c1_i32 : i32
    %1 = arith.addi %0, %arg1 : i32
    %c0_i32 = arith.constant 0 : i32
    %c0_i32_0 = arith.constant 0 : i32
    return %1, %c0_i32 : i32, i32
  }
  func.func @transform_2(%arg0: i32, %arg1: i32) -> (i32, i32) {
    %c0_i32 = arith.constant 0 : i32
    %c0_i32_0 = arith.constant 0 : i32
    %c0_i32_1 = arith.constant 0 : i32
    return %c0_i32, %c0_i32_0 : i32, i32
  }
  func.func @transform_3(%arg0: i32, %arg1: i32) -> (i32, i32) {
    %c0_i32 = arith.constant 0 : i32
    %c0_i32_0 = arith.constant 0 : i32
    %c0_i32_1 = arith.constant 0 : i32
    return %c0_i32, %c0_i32_0 : i32, i32
  }
  func.func @transform_4(%arg0: i32, %arg1: i32) -> (i32, i32, i32) {
    %c0_i32 = arith.constant 0 : i32
    %c0_i32_0 = arith.constant 0 : i32
    %c0_i32_1 = arith.constant 0 : i32
    return %arg0, %c0_i32, %c0_i32_0 : i32, i32, i32
  }
}

</mosaic_0001>

<bundles_post_ra>
// kernel: tpu_custom_call.1
= control target key start
LH: loop header
LB: loop body
LE: loop exit
PB: predicated region body
PF: predicated region fallthrough
CT: control target
= control target key end

     0   :  { %9 = vsyncpa [#allocation3], 0  ;;  %s751_s0 = inlined_call_operand.hbm [shape: f32[16,128], index: 0, kind: input, shape index: {}]   ;;  %s752_s1 = inlined_call_operand.hbm [shape: f32[16,128], index: 1, kind: input, shape index: {}]   ;;  %s753_s2 = inlined_call_operand.vmem [shape: f32[1,128], index: 2, kind: input, shape index: {}]   ;;  %s754_s3 = inlined_call_operand.vmem [shape: f32[1,128], index: 3, kind: input, shape index: {}]   ;;  %s755_s4 = inlined_call_operand.vmem [shape: f32[2,1,1], index: 4, kind: output, shape index: {}]  }
   0x1   :  { %11 = vsyncpa [#allocation3 + $0x1], 0 }
   0x2   :  { %12 = vsyncpa [#allocation5], 0 }
   0x3   :  { %14 = vsyncpa [#allocation5 + $0x1], 0  ;;  %s649_s15 = smov 0   ;;  %s651_s16 = smov 0  }
   0x4   :  { %s653_s17 = smov 0   ;;  %s655_s18 = smov 0  }
   0x5   :  { %s657_s19 = smov 0   ;;  %s659_s20 = smov 0  }
   0x6 LB: > { %s424_s21 = sadd.s32 4294967295, %s621_s20   ;;  %s32_s22 = sadd.s32 1, %s617_s19  ;;  %s621_s20 = sphi %s659_s20, %s20_s20   ;;  %s617_s19 = sphi %s657_s19, %s762_s19   ;;  %s613_s18 = sphi %s655_s18, %s761_s18   ;;  %s609_s17 = sphi %s653_s17, %s760_s17   ;;  %s605_s16 = sphi %s651_s16, %s759_s16   ;;  %s601_s15 = sphi %s649_s15, %s758_s15  }
   0x7   : > { %p34_p0 = scmp.ge.s32.totalorder %s32_s22, 2  ;;  %s41_s23 = sadd.s32 1, %s609_s17 }
   0x8   : > { %p48_p1 = scmp.ne.s32.totalorder %s609_s17, %s605_s16  ;;  %p49_p2 = scmp.eq.s32.totalorder %s621_s20, 0 }
   0x9   : > { %s764_s22 = smov (%p34_p0, %s32_s22), 0  ;;  %p54_p4 = scmp.ne.s32.totalorder %s605_s16, %s601_s15 }
   0xa   : > { %p685_p3 = por %p49_p2, %p48_p1  ;;  %s38_s25 = ssub.s32 %s617_s19, %s764_s22 }
   0xb   : > { %p55_p5 = scmp.eq.s32.totalorder %s424_s21, 0  ;;  %p39_p6 = scmp.eq.s32.totalorder %s38_s25, 0 }
   0xc   : > { %p451_p8 = scmp.lt.s32.totalorder %s621_s20, 2  ;;  %s180_s28 = sand.u32 1, %s609_s17  }
   0xd   : > { %p692_p7 = por %p55_p5, %p54_p4  ;;  %s429_s29 = sshll.u32 %s617_s19, 3 }
   0xe   : > { %s698_s27 = scalar_select %p39_p6, %s609_s17, %s41_s23  }
   0xf   : > { %s428_s30 = sshll.u32 %s180_s28, 3  ;;  %s189_s7 = scalar_lea.hbm %s751_s0, %s429_s29 }
  0x10   : > { %s191_s8 = sshll.u32 %s189_s7, 4  ;;  %s184_s9 = scalar_lea.vmem [#allocation2], %s428_s30  ;;  %s192_s8 = int_to_ptr.hbm [resolvable:$true] %s191_s8 }
  0x11   : > { %s193_s10 = sshll.u32 %s184_s9, 4  ;;  %p445_p9 = pnand %p451_p8, %p685_p3  ;;  %s194_s10 = int_to_ptr.vmem [resolvable:$true] %s193_s10 }
  0x12   : > { %p432_p10 = scmp.ge.s32.totalorder %s621_s20, 1  ;;  %p218_p11 = scmp.lt.s32.totalorder %s621_s20, 3 }
  0x13   : > { %s181_s11 = scalar_lea.sflag [#allocation3], %s180_s28  ;;  %s209_s14 = scalar_lea.hbm %s752_s1, %s429_s29 }
  0x14   : > { %447 = dma.hbm_to_vmem [thread:$0]  (!%p445_p9), %s192_s8, 128, %s194_s10, %s181_s11  }
  0x15   : > { %p219_p12 = pnand %p432_p10, %p218_p11  ;;  %s211_s15 = sshll.u32 %s209_s14, 4  ;;  %s212_s15 = int_to_ptr.hbm [resolvable:$true] %s211_s15 }
  0x16   : > { %s204_s21 = scalar_lea.vmem [#allocation4], %s428_s30  ;;  %s201_s25 = scalar_lea.sflag [#allocation5], %s180_s28 }
  0x17   : > { %s213_s23 = sshll.u32 %s204_s21, 4  ;;  %222 = sbr.rel (%p219_p12) target bundleno = 246 (0xf6), region = 36  ;;  %s214_s23 = int_to_ptr.vmem [resolvable:$true] %s213_s23 }
  0x18   : > { %450 = dma.hbm_to_vmem [thread:$0]  (!%p445_p9), %s212_s15, 128, %s214_s23, %s201_s25  }
  0x19   : > { %s224_s24 = sand.u32 (!%p219_p12), 1, %s605_s16  }
  0x1a   : > { %s433_s5 = sshll.u32 (!%p219_p12), %s224_s24, 3  ;;  %s225_s6 = scalar_lea.sflag (!%p219_p12), [#allocation3], %s224_s24 }
  0x1b   : > { %s228_s7 = scalar_lea.vmem (!%p219_p12), [#allocation2], %s433_s5 }
  0x1c   : > { %592 = dma.done.wait (%p692_p7), %s225_s6, 128  }
  0x1d   : > { %594 = vsyncadd (%p692_p7), %s225_s6, 4294967168  ;;  %s235_s29 = scalar_lea.sflag [#allocation5], %s224_s24  ;;  %s238_s30 = scalar_lea.vmem [#allocation4], %s433_s5 }
  0x1e   : > { %596 = dma.done.wait (%p692_p7), %s235_s29, 128  }
  0x1f   : > { %598 = vsyncadd (%p692_p7), %s235_s29, 4294967168  ;;  %v278_v0 = vld [vmem:[%s228_s7] sm:$0xff]  ;;  %v279_v7 = vld [vmem:[%s238_s30] sm:$0xff]  ;;  %v312_v9 = vlaneseq  ;;  %s435_s28 = sshll.u32 %s613_s18, 3  ;;  %p269_p13 = scmp.lt.s32.totalorder %s613_s18, 1  ;;  %vm276_vm2 = vcmask 0  }
  0x20   : > { %v285_v1 = vand.u32 2147483647, %v278_v0  ;;  %v282_v10 = vmax.f32 %v278_v0, 0.0  ;;  %v283_v11 = vmul.f32 %v279_v7, %v278_v0  ;;  %v299_v13 = vsub.f32 %v278_v0, %v279_v7  ;;  %v502_v19 = vld [vmem:[%s754_s3] ss:$0 sm:$0xff] }
  0x21   : > { %v313_v15 = vshrl.u32 %v312_v9, 7  ;;  %v314_v20 = vstv %s435_s28  ;;  %v501_v22 = vld [vmem:[%s753_s2] ss:$0 sm:$0xff]  ;;  %s766_s18 = smov (!%p269_p13, %s613_s18), 1  ;;  %v623_v30 = vmov 0.0  }
  0x22   : > { %v286_v2 = vsub.f32 0.0, %v285_v1  ;;  %v284_v17 = vsub.f32 %v282_v10, %v283_v11  ;;  %v300_v18 = vmul.f32 %v299_v13, %v299_v13  ;;  %s271_s13 = scalar_lea.vmem %s755_s4, %s766_s18 }
  0x23   : > { %v315_v24 = vadd.s32 %v314_v20, %v313_v15  ;;  %277 = vst.msk [vmem:[%s271_s13] sm:$0x1] %vm276_vm2, %v623_v30 }
  0x24   : > { %v287_v3 = vmul.f32 1.442695, %v286_v2  ;;  %v308_v26 = vmul.f32 %v502_v19, %v300_v18 }
  0x25   : > { %vm316_vm1 = vcmp.lt.s32.totalorder %v315_v24, 8 }
  0x26   : > { %503 = vpow2.f32 %v287_v3 }
  0x2a   : > { %v318_v38 = vld [vmem:[%s271_s13] sm:$0x1] }
  0x2c   : > { %v504_v4 = vpop.eup %503 }
  0x2d   : > { %v289_v5 = vadd.f32 1.0, %v504_v4  ;;  %v292_v6 = vmul.f32 -0.5, %v504_v4  ;;  %v295_v12 = vand.u32 2147483647, %v504_v4 }
  0x2f   : > { %505 = vlog2.f32 %v289_v5  ;;  %v293_v8 = vadd.f32 1.0, %v292_v6  ;;  %vm296_vm0 = vcmp.lt.f32.partialorder %v295_v12, 0.0004427343 }
  0x31   : > { %v294_v14 = vmul.f32 %v504_v4, %v293_v8 }
  0x35   : > { %v506_v16 = vpop.eup %505 }
  0x36   : > { %v291_v21 = vmul.f32 0.6931472, %v506_v16 }
  0x38   : > { %v297_v23 = vsel %vm296_vm0, %v294_v14, %v291_v21 }
  0x39   : > { %v298_v25 = vadd.f32 %v297_v23, %v284_v17 }
  0x3b   : > { %v304_v27 = vmul.f32 %v501_v22, %v298_v25 }
  0x3d   : > { %v309_v28 = vadd.f32 %v308_v26, %v304_v27 }
  0x3f   : > { %v317_v29 = vsel %vm316_vm1, %v309_v28, 0.0 }
  0x40   : > { %319 = vadd.xlane.f32.xlu0 %v317_v29 }
  0xb3   : > { %v320_v31 = vpop.xlane.xlu0 %319 }
  0xb4   : > { %v321_v32 = vrot.slane %v320_v31, 4 }
  0xb6   : > { %v322_v33 = vadd.f32 %v321_v32, %v320_v31 }
  0xb8   : > { %v323_v34 = vrot.slane %v322_v33, 2 }
  0xba   : > { %v324_v35 = vadd.f32 %v323_v34, %v322_v33 }
  0xbc   : > { %v325_v36 = vrot.slane %v324_v35, 1 }
  0xbe   : > { %v326_v37 = vadd.f32 %v325_v36, %v324_v35 }
  0xc0   : > { %438 = vpush %v326_v37 }
  0xf1   : > { %s439_s14 = spop %438 }
  0xf2   : > { %v328_v39 = vstv %s439_s14 }
  0xf3   : > { %v329_v40 = vadd.f32 %v328_v39, %v318_v38 }
  0xf5   : > { %331 = vst.msk [vmem:[%s271_s13] sm:$0x1] %vm276_vm2, %v329_v40 }
  0xf6 PF: > { %s20_s20 = sadd.s32 1, %s621_s20   ;;  %s758_s15 = smov %s605_s16 }
  0xf7   : > { %p17_p0 = scmp.ge.s32.totalorder %s20_s20, 4   ;;  %s759_s16 = smov %s609_s17 }
  0xf8   : > { %s760_s17 = smov %s698_s27  ;;  %s761_s18 = smov %s617_s19 }
  0xf9   : > { %s762_s19 = smov %s764_s22  ;;  %19 = sbr.rel (!%p17_p0) target bundleno = 6 (0x6), region = 93 }
  0xfe   :  { %349 = vsyncpa [#allocation3], 1 }
  0xff   :  { %351 = vsyncpa [#allocation3 + $0x1], 1 }
 0x100   :  { %352 = vsyncpa [#allocation5], 1 }
 0x101   :  { %354 = vsyncpa [#allocation5 + $0x1], 1 }

</bundles_post_ra>
